<compile_context>
chip_gen: v6e
topology: v6e:2x2x1
jax: 0.10.0
libtpu: 0.0.40
codegen_flags: <defaults>
</compile_context>

<pallas_src>
import functools

import jax
import jax.numpy as jnp
from jax.experimental import pallas as pl
from jax.experimental.pallas import tpu as pltpu


def _round_up(x, m):
    return (x + m - 1) // m * m


def _row_parallel_matmul_kernel(x_ref, w_ref, b_ref, o_ref, acc_ref):
    # x_ref: (tm, tk)  activation tile
    # w_ref: (tk, tn)  pre-transposed weight tile (K on sublanes, N on lanes)
    # b_ref: (1, tn)   summed bias tile (added only at finalize)
    # o_ref: (tm, tn)  output tile
    # acc_ref: (tm, tn) f32 accumulator, persistent across the K axis
    k = pl.program_id(2)

    @pl.when(k == 0)
    def _():
        acc_ref[...] = jnp.zeros_like(acc_ref)

    acc_ref[...] += jnp.dot(
        x_ref[...], w_ref[...], preferred_element_type=jnp.float32
    )

    @pl.when(k == pl.num_programs(2) - 1)
    def _():
        o_ref[...] = (
            acc_ref[...] + b_ref[...].astype(jnp.float32)
        ).astype(o_ref.dtype)


@functools.partial(jax.jit, static_argnames=("world_size", "tm", "tn", "tk"))
def row_parallel_linear(x, weight_shards, bias_shards, *, world_size,
                        tm=256, tn=256, tk=512):
    """x: [..., input_size]; weight_shards: [world_size, N, K_per];
    bias_shards: [world_size, N].  Returns [..., N]."""
    *lead, input_size = x.shape
    ws, n_out, k_per = weight_shards.shape
    assert ws == world_size and input_size == world_size * k_per
    assert bias_shards.shape == (world_size, n_out)

    m = 1
    for d in lead:
        m *= d
    k_total = input_size

    # One-time (static-weight) transform: concat_r(W_r, axis=-1).T -> (K_total, N).
    # The rank-major K layout matches the column layout of x_flat, so
    # x_flat @ w_t == sum_r(chunk_r @ W_r.T) exactly.
    w_t = jnp.transpose(weight_shards, (0, 2, 1)).reshape(k_total, n_out)
    # Bias hoisted out of the per-rank accumulation: sum_r(b_r).
    bias_sum = jnp.sum(bias_shards.astype(jnp.float32), axis=0)

    # Flatten leading dims only (free reshape) — no HBM transpose of x.
    x_flat = x.reshape(m, k_total)

    # Clip tiles to the (aligned) problem size; keep (8,128) alignment.
    tm_ = min(tm, _round_up(m, 8))
    tn_ = min(tn, _round_up(n_out, 128))
    tk_ = min(tk, _round_up(k_total, 128))

    m_pad = _round_up(m, tm_)
    n_pad = _round_up(n_out, tn_)
    k_pad = _round_up(k_total, tk_)

    if (m_pad, k_pad) != (m, k_total):
        x_flat = jnp.pad(x_flat, ((0, m_pad - m), (0, k_pad - k_total)))
    if (k_pad, n_pad) != (k_total, n_out):
        w_t = jnp.pad(w_t, ((0, k_pad - k_total), (0, n_pad - n_out)))
    bias_2d = bias_sum.reshape(1, n_out).astype(x.dtype)
    if n_pad != n_out:
        bias_2d = jnp.pad(bias_2d, ((0, 0), (0, n_pad - n_out)))

    grid = (m_pad // tm_, n_pad // tn_, k_pad // tk_)

    itemsize = jnp.dtype(x.dtype).itemsize
    cost = pl.CostEstimate(
        flops=2 * m * n_out * k_total,
        transcendentals=0,
        bytes_accessed=(m_pad * k_pad * itemsize
                        + k_pad * n_pad * itemsize
                        + n_pad * itemsize
                        + m_pad * n_pad * itemsize),
    )

    out = pl.pallas_call(
        _row_parallel_matmul_kernel,
        out_shape=jax.ShapeDtypeStruct((m_pad, n_pad), x.dtype),
        grid_spec=pltpu.PrefetchScalarGridSpec(
            num_scalar_prefetch=0,
            grid=grid,
            in_specs=[
                pl.BlockSpec((tm_, tk_), lambda i, j, k: (i, k)),
                pl.BlockSpec((tk_, tn_), lambda i, j, k: (k, j)),
                pl.BlockSpec((1, tn_), lambda i, j, k: (0, j)),
            ],
            out_specs=pl.BlockSpec((tm_, tn_), lambda i, j, k: (i, j)),
            scratch_shapes=[pltpu.VMEM((tm_, tn_), jnp.float32)],
        ),
        compiler_params=pltpu.CompilerParams(
            dimension_semantics=("parallel", "parallel", "arbitrary"),
            vmem_limit_bytes=64 * 1024 * 1024,
        ),
        cost_estimate=cost,
    )(x_flat, w_t, bias_2d)

    out = out[:m, :n_out]
    return out.reshape(*lead, n_out)


if __name__ == "__main__":
    # Small deterministic setup consistent with the module's __init__.
    world_size = 2
    batch, seq = 2, 8
    input_size, output_size = 32, 64
    k_per = input_size // world_size  # input_size_per_partition

    key = jax.random.PRNGKey(0)
    kx, kw, kb = jax.random.split(key, 3)

    x = jax.random.normal(kx, (batch, seq, input_size), dtype=jnp.float32)
    # One weight/bias shard per simulated rank: W_r is (output_size, k_per),
    # b_r is (output_size,) — exactly the shapes in RowParallelLinear.__init__.
    weight_shards = jax.random.normal(
        kw, (world_size, output_size, k_per), dtype=jnp.float32) * 0.02
    bias_shards = jax.random.normal(
        kb, (world_size, output_size), dtype=jnp.float32) * 0.02

    y = row_parallel_linear(x, weight_shards, bias_shards, world_size=world_size)
    y = jax.block_until_ready(y)

    # Pure-JAX reference of the exact distributed semantics:
    # sum_r ( x_chunk_r @ W_r.T + b_r )
    x_flat = x.reshape(-1, input_size)
    chunks = jnp.split(x_flat, world_size, axis=-1)
    ref = sum(
        chunks[r] @ weight_shards[r].T + bias_shards[r][None, :]
        for r in range(world_size)
    ).reshape(batch, seq, output_size)

    assert y.shape == (batch, seq, output_size)
    assert jnp.allclose(y, ref, atol=1e-4, rtol=1e-4)

    print("KERNEL_OK")
</pallas_src>

<mosaic_0001>
module attributes {stable_mosaic.version = 11 : i64} {
  func.func @_row_parallel_matmul_kernel(%arg0: i32, %arg1: i32, %arg2: i32, %arg3: memref<16x128xf32, #tpu.memory_space<vmem>>, %arg4: memref<128x128xf32, #tpu.memory_space<vmem>>, %arg5: memref<1x128xf32, #tpu.memory_space<vmem>>, %arg6: memref<16x128xf32, #tpu.memory_space<vmem>>, %arg7: memref<16x128xf32, #tpu.memory_space<vmem>>) attributes {dimension_semantics = [#tpu.dimension_semantics<parallel>, #tpu.dimension_semantics<parallel>, #tpu.dimension_semantics<arbitrary>], iteration_bounds = array<i64: 1, 1, 1>, scalar_prefetch = 0 : i64, scratch_operands = 1 : i64, tpu.core_type = #tpu.core_type<tc>, window_params = [{transform_indices = @transform_0, window_bounds = array<i64: 16, 128>}, {transform_indices = @transform_1, window_bounds = array<i64: 128, 128>}, {transform_indices = @transform_2, window_bounds = array<i64: 1, 128>}, {transform_indices = @transform_3, window_bounds = array<i64: 16, 128>}]} {
    %c0_i32 = arith.constant 0 : i32
    %0 = arith.cmpi eq, %arg2, %c0_i32 : i32
    %1 = arith.extui %0 : i1 to i32
    %c0_i32_0 = arith.constant 0 : i32
    %2 = arith.cmpi ne, %1, %c0_i32_0 : i32
    scf.if %2 {
      %cst_10 = arith.constant 0.000000e+00 : f32
      %12 = vector.broadcast %cst_10 : f32 to vector<16x128xf32>
      %c0_11 = arith.constant 0 : index
      %c0_12 = arith.constant 0 : index
      %13 = vector.load %arg7[%c0_11, %c0_12] : memref<16x128xf32, #tpu.memory_space<vmem>>, vector<16x128xf32>
      tpu.vector_store %arg7[%c0_11, %c0_12], %12 {strides = array<i32>} : memref<16x128xf32, #tpu.memory_space<vmem>>, vector<16x128xf32>,
    } else {
    }
    %c0 = arith.constant 0 : index
    %c0_1 = arith.constant 0 : index
    %3 = vector.load %arg7[%c0, %c0_1] : memref<16x128xf32, #tpu.memory_space<vmem>>, vector<16x128xf32>
    %c0_2 = arith.constant 0 : index
    %c0_3 = arith.constant 0 : index
    %4 = vector.load %arg3[%c0_2, %c0_3] : memref<16x128xf32, #tpu.memory_space<vmem>>, vector<16x128xf32>
    %c0_4 = arith.constant 0 : index
    %c0_5 = arith.constant 0 : index
    %5 = vector.load %arg4[%c0_4, %c0_5] : memref<128x128xf32, #tpu.memory_space<vmem>>, vector<128x128xf32>
    %cst = arith.constant dense<0.000000e+00> : vector<16x128xf32>
    %6 = tpu.matmul %4, %5, %cst {dimension_numbers = #tpu.dot_dimension_numbers<[1], [0], [0], [1], [0, 0, 1, 1], [], []>} : vector<16x128xf32>, vector<128x128xf32>, vector<16x128xf32> -> vector<16x128xf32>
    %7 = arith.addf %3, %6 : vector<16x128xf32>
    %c0_6 = arith.constant 0 : index
    %c0_7 = arith.constant 0 : index
    %8 = vector.load %arg7[%c0_6, %c0_7] : memref<16x128xf32, #tpu.memory_space<vmem>>, vector<16x128xf32>
    tpu.vector_store %arg7[%c0_6, %c0_7], %7 {strides = array<i32>} : memref<16x128xf32, #tpu.memory_space<vmem>>, vector<16x128xf32>,
    %c0_i32_8 = arith.constant 0 : i32
    %9 = arith.cmpi eq, %arg2, %c0_i32_8 : i32
    %10 = arith.extui %9 : i1 to i32
    %c0_i32_9 = arith.constant 0 : i32
    %11 = arith.cmpi ne, %10, %c0_i32_9 : i32
    scf.if %11 {
      %c0_10 = arith.constant 0 : index
      %c0_11 = arith.constant 0 : index
      %12 = vector.load %arg7[%c0_10, %c0_11] : memref<16x128xf32, #tpu.memory_space<vmem>>, vector<16x128xf32>
      %c0_12 = arith.constant 0 : index
      %c0_13 = arith.constant 0 : index
      %13 = vector.load %arg5[%c0_12, %c0_13] : memref<1x128xf32, #tpu.memory_space<vmem>>, vector<1x128xf32>
      %14 = vector.broadcast %13 : vector<1x128xf32> to vector<16x128xf32>
      %15 = arith.addf %12, %14 : vector<16x128xf32>
      %c0_14 = arith.constant 0 : index
      %c0_15 = arith.constant 0 : index
      %16 = vector.load %arg6[%c0_14, %c0_15] : memref<16x128xf32, #tpu.memory_space<vmem>>, vector<16x128xf32>
      tpu.vector_store %arg6[%c0_14, %c0_15], %15 {strides = array<i32>} : memref<16x128xf32, #tpu.memory_space<vmem>>, vector<16x128xf32>,
    } else {
    }
    return
  }
  func.func @transform_0(%arg0: i32, %arg1: i32, %arg2: i32) -> (i32, i32) {
    %c0_i32 = arith.constant 0 : i32
    return %arg0, %arg2 : i32, i32
  }
  func.func @transform_1(%arg0: i32, %arg1: i32, %arg2: i32) -> (i32, i32) {
    %c0_i32 = arith.constant 0 : i32
    return %arg2, %arg1 : i32, i32
  }
  func.func @transform_2(%arg0: i32, %arg1: i32, %arg2: i32) -> (i32, i32) {
    %c0_i32 = arith.constant 0 : i32
    %c0_i32_0 = arith.constant 0 : i32
    return %c0_i32, %arg1 : i32, i32
  }
  func.func @transform_3(%arg0: i32, %arg1: i32, %arg2: i32) -> (i32, i32) {
    %c0_i32 = arith.constant 0 : i32
    return %arg0, %arg1 : i32, i32
  }
}

</mosaic_0001>

<bundles_post_ra>
// kernel: row_parallel_linear.1
= control target key start
LH: loop header
LB: loop body
LE: loop exit
PB: predicated region body
PF: predicated region fallthrough
CT: control target
= control target key end

     0   :  { %s276_s1 = inlined_call_operand.vmem [shape: f32[128,128], index: 1, kind: input, shape index: {}]   ;;  %s277_s0 = inlined_call_operand.vmem [shape: f32[16,128], index: 0, kind: input, shape index: {}]   ;;  %s278_s2 = inlined_call_operand.vmem [shape: f32[1,128], index: 2, kind: input, shape index: {}]   ;;  %s279_s3 = inlined_call_operand.vmem [shape: f32[16,128], index: 3, kind: output, shape index: {}]  }
   0x1   :  { %v39_v0 = vld [vmem:[%s276_s1 + $0x78] sm:$0xff]  ;;  %v38_v1 = vld [vmem:[%s276_s1 + $0x70] sm:$0xff]  ;;  %v37_v2 = vld [vmem:[%s276_s1 + $0x68] sm:$0xff] }
   0x2   :  { %158 = vmatprep.subr.mxu0 %v39_v0  ;;  %v36_v3 = vld [vmem:[%s276_s1 + $0x60] sm:$0xff]  ;;  %v35_v5 = vld [vmem:[%s276_s1 + $0x58] sm:$0xff]  ;;  %v34_v6 = vld [vmem:[%s276_s1 + $0x50] sm:$0xff] }
   0x3   :  { %159 = vmatpush3.msra.mxu0 %v39_v0  ;;  %v22_v4 = vld [vmem:[%s277_s0] sm:$0xff]  ;;  %v33_v7 = vld [vmem:[%s276_s1 + $0x48] sm:$0xff]  ;;  %v31_v9 = vld [vmem:[%s276_s1 + $0x38] sm:$0xff] }
   0x4   :  { %160 = vmatprep.subr.mxu0 %v38_v1  ;;  %190 = vmatprep.mubr.f32.mxu0 %v22_v4  ;;  %v32_v8 = vld [vmem:[%s276_s1 + $0x40] sm:$0xff]  ;;  %v30_v10 = vld [vmem:[%s276_s1 + $0x30] sm:$0xff]  ;;  %v29_v11 = vld [vmem:[%s276_s1 + $0x28] sm:$0xff] }
   0x5   :  { %161 = vmatpush3.msra.mxu0 %v38_v1  ;;  %v28_v12 = vld [vmem:[%s276_s1 + $0x20] sm:$0xff]  ;;  %v27_v13 = vld [vmem:[%s276_s1 + $0x18] sm:$0xff]  ;;  %v26_v14 = vld [vmem:[%s276_s1 + $0x10] sm:$0xff] }
   0x6   :  { %162 = vmatprep.subr.mxu0 %v37_v2  ;;  %v25_v15 = vld [vmem:[%s276_s1 + $0x8] sm:$0xff]  ;;  %v24_v16 = vld [vmem:[%s276_s1] sm:$0xff] }
   0x7   :  { %163 = vmatpush3.msra.mxu0 %v37_v2  ;;  %v23_v17 = vld [vmem:[%s277_s0 + $0x8] sm:$0xff]  ;;  %v139_v18 = vld [vmem:[%s278_s2] ss:$0 sm:$0xff] }
   0x8   :  { %164 = vmatprep.subr.mxu0 %v36_v3 }
   0x9   :  { %165 = vmatpush3.msra.mxu0 %v36_v3 }
   0xa   :  { %166 = vmatprep.subr.mxu0 %v35_v5 }
   0xb   :  { %167 = vmatpush3.msra.mxu0 %v35_v5 }
   0xc   :  { %168 = vmatprep.subr.mxu0 %v34_v6 }
   0xd   :  { %169 = vmatpush3.msra.mxu0 %v34_v6 }
   0xe   :  { %170 = vmatprep.subr.mxu0 %v33_v7 }
   0xf   :  { %171 = vmatpush3.msra.mxu0 %v33_v7 }
  0x10   :  { %172 = vmatprep.subr.mxu0 %v32_v8 }
  0x11   :  { %173 = vmatpush3.msra.mxu0 %v32_v8 }
  0x12   :  { %174 = vmatprep.subr.mxu0 %v31_v9 }
  0x13   :  { %175 = vmatpush3.msra.mxu0 %v31_v9 }
  0x14   :  { %176 = vmatprep.subr.mxu0 %v30_v10 }
  0x15   :  { %177 = vmatpush3.msra.mxu0 %v30_v10 }
  0x16   :  { %178 = vmatprep.subr.mxu0 %v29_v11 }
  0x17   :  { %179 = vmatpush3.msra.mxu0 %v29_v11 }
  0x18   :  { %180 = vmatprep.subr.mxu0 %v28_v12 }
  0x19   :  { %181 = vmatpush3.msra.mxu0 %v28_v12 }
  0x1a   :  { %182 = vmatprep.subr.mxu0 %v27_v13 }
  0x1b   :  { %183 = vmatpush3.msra.mxu0 %v27_v13 }
  0x1c   :  { %184 = vmatprep.subr.mxu0 %v26_v14 }
  0x1d   :  { %185 = vmatpush3.msra.mxu0 %v26_v14 }
  0x1e   :  { %186 = vmatprep.subr.mxu0 %v25_v15 }
  0x1f   :  { %187 = vmatpush3.msra.mxu0 %v25_v15 }
  0x20   :  { %188 = vmatprep.subr.mxu0 %v24_v16 }
  0x21   :  { %189 = vmatpush3.msra.mxu0 %v24_v16 }
  0x22   :  { %191 = vmatmul.mubr.f32.vlgmr.msra.gmra.mxu0 %v23_v17 }
  0xe2   :  { %v192_v19 = vpop.f32.mrf.mxu0 }
  0xe3   :  { %v132_v20 = vadd.f32 %v192_v19, %v139_v18 }
  0xe4   :  { %v106_v21 = vpop.f32.mrf.mxu0 }
  0xe5   :  { %134 = vst [vmem:[%s279_s3 + $0x8] sm:$0xff] %v132_v20  ;;  %v131_v22 = vadd.f32 %v139_v18, %v106_v21 }
  0xe7   :  { %133 = vst [vmem:[%s279_s3] sm:$0xff] %v131_v22 }

</bundles_post_ra>
